<compile_context>
chip_gen: v7x
topology: tpu7x:2x2x1
jax: 0.10.0
libtpu: 0.0.40
codegen_flags: <defaults>
</compile_context>

<pallas_src>
import jax
import jax.numpy as jnp
from jax.experimental import pallas as pl
from jax.experimental.pallas import tpu as pltpu

_EPS = 1e-5


def _round_up(x, m):
    return ((x + m - 1) // m) * m


def _vmem_limit_bytes():
    """Generation-aware scoped-VMEM limit (v5e/v6e: 128 MiB, v7x: 64 MiB/TC)."""
    cap = 64 * 1024 * 1024                      # conservative fallback (v7x per-core)
    try:
        cap = int(pltpu.get_tpu_info().vmem_capacity_bytes)
    except Exception:
        pass
    cap = min(cap, 128 * 1024 * 1024)
    return (cap * 3) // 4                       # headroom for Mosaic internal scratch


def _pick_tile(rows, per_row_bytes, budget_bytes, cap_rows=1024):
    """Largest multiple-of-8 row tile that fits the per-tile VMEM budget."""
    t = budget_bytes // max(per_row_bytes, 1)
    t = min(int(t), cap_rows, _round_up(max(rows, 1), 8))
    return max(8, (t // 8) * 8)


def prepare_prenorm_params(gamma, beta, w_t, b):
    """Pad/cast static parameters once (hoisted out of the per-call path).

    gamma/beta/b: (D,); w_t: (D, D) = W^T of the Linear `fn`.
    Returns (gamma_f32 (1,D), beta_f32 (1,D), w_bf16 (D,Dp), bias_f32 (1,Dp)).
    """
    D = gamma.shape[0]
    Dp = _round_up(D, 128)                      # lane-dense matmul output width
    gamma2 = gamma.astype(jnp.float32).reshape(1, D)
    beta2 = beta.astype(jnp.float32).reshape(1, D)
    b_p = jnp.pad(b.astype(jnp.float32), (0, Dp - D)).reshape(1, Dp)
    w_p = jnp.pad(w_t.astype(jnp.bfloat16), ((0, 0), (0, Dp - D)))   # (D, Dp)
    return gamma2, beta2, w_p, b_p


def prenorm(x, params):
    """x: (B, N, D); params = prepare_prenorm_params(gamma, beta, w_t, b)."""
    gamma2, beta2, w_p, b_p = params
    B, N, D = x.shape
    Dp = w_p.shape[1]
    R = B * N
    x2 = x.reshape(R, D)                        # free (row-major), no pad copy
    x_bytes = jnp.dtype(x.dtype).itemsize
    o_bytes = jnp.dtype(x.dtype).itemsize

    vmem_limit = _vmem_limit_bytes()
    budget = (vmem_limit * 17) // 20            # ~85% of scoped limit for tiles

    # ---- Pass 1: per-channel sum / sum-of-squares ---------------------------
    # Streaming-only (no resident W) -> take the biggest tile that fits.
    tm1 = _pick_tile(R, 2 * D * x_bytes, budget)
    n_tiles1 = pl.cdiv(R, tm1)
    nsplit = 2 if n_tiles1 >= 2 else 1          # 2 partial blocks -> both v7x TCs
    tiles_per_split = pl.cdiv(n_tiles1, nsplit)

    def stats_kernel(x_ref, s_ref, sq_ref):
        c = pl.program_id(0)
        i = pl.program_id(1)

        @pl.when(i == 0)
        def _():
            s_ref[...] = jnp.zeros_like(s_ref)
            sq_ref[...] = jnp.zeros_like(sq_ref)

        # Mask rows past R (partial last tile and fully-clamped spare tiles).
        start = (c * tiles_per_split + i) * tm1
        rows = jax.lax.broadcasted_iota(jnp.int32, (tm1, 1), 0) + start
        xv = jnp.where(rows < R, x_ref[...].astype(jnp.float32), 0.0)  # (tm1, D)
        s_ref[...] += jnp.sum(xv, axis=0, keepdims=True).reshape(1, 1, D)
        sq_ref[...] += jnp.sum(xv * xv, axis=0, keepdims=True).reshape(1, 1, D)

    def x_map1(c, i):
        # Clamp so a spare (fully out-of-range) tile re-reads a valid block;
        # its rows are masked to zero in-kernel so it contributes nothing.
        return (jnp.minimum(c * tiles_per_split + i, n_tiles1 - 1), 0)

    s, sq = pl.pallas_call(
        stats_kernel,
        out_shape=(jax.ShapeDtypeStruct((nsplit, 1, D), jnp.float32),
                   jax.ShapeDtypeStruct((nsplit, 1, D), jnp.float32)),
        grid=(nsplit, tiles_per_split),
        in_specs=[pl.BlockSpec((tm1, D), x_map1)],
        out_specs=(pl.BlockSpec((1, 1, D), lambda c, i: (c, 0, 0)),
                   pl.BlockSpec((1, 1, D), lambda c, i: (c, 0, 0))),
        compiler_params=pltpu.CompilerParams(
            dimension_semantics=("parallel", "arbitrary"),
            vmem_limit_bytes=vmem_limit),
        cost_estimate=pl.CostEstimate(
            flops=3 * R * D,
            transcendentals=0,
            bytes_accessed=R * D * x_bytes + 2 * nsplit * D * 4),
    )(x2)

    # ---- Pass 2: normalize (BN folded to scale/shift) + Linear(D, D) ---------
    fixed2 = 2 * D * Dp * 2 + (2 * nsplit * D + 2 * D + Dp) * 4 * 2
    per_row2 = 2 * D * x_bytes + 2 * Dp * o_bytes
    tm2 = _pick_tile(R, per_row2, max(budget - fixed2, 8 * per_row2))
    n_tiles2 = pl.cdiv(R, tm2)
    inv_r = 1.0 / float(R)

    def norm_fn_kernel(x_ref, s_ref, sq_ref, g_ref, be_ref, w_ref, b_ref, o_ref):
        # Fold the BN epilogue in-kernel: combine per-split partial stats and
        # recompute scale/shift per tile (D-wide rsqrt rides the idle EUP slot).
        # TODO(synk): E[x^2]-mean^2 can cancel for |mean| >> std; switch to a
        # shifted/Welford accumulation if inputs are far from zero-mean.
        s_tot = jnp.sum(s_ref[...], axis=0)                   # (1, D) f32
        sq_tot = jnp.sum(sq_ref[...], axis=0)                 # (1, D) f32
        mean = s_tot * inv_r                                  # biased stats
        var = jnp.maximum(sq_tot * inv_r - mean * mean, 0.0)
        inv_std = jax.lax.rsqrt(var + _EPS)
        scale = g_ref[...] * inv_std                          # (1, D)
        shift = be_ref[...] - mean * scale                    # (1, D)
        xv = x_ref[...].astype(jnp.float32)                   # (tm2, D)
        y = (xv * scale + shift).astype(jnp.bfloat16)
        out = jnp.dot(y, w_ref[...], preferred_element_type=jnp.float32)
        o_ref[...] = (out + b_ref[...]).astype(o_ref.dtype)

    out2 = pl.pallas_call(
        norm_fn_kernel,
        out_shape=jax.ShapeDtypeStruct((R, Dp), x.dtype),
        grid=(n_tiles2,),
        in_specs=[
            pl.BlockSpec((tm2, D), lambda i: (i, 0)),            # x tile (streamed)
            pl.BlockSpec((nsplit, 1, D), lambda i: (0, 0, 0)),   # sum partials
            pl.BlockSpec((nsplit, 1, D), lambda i: (0, 0, 0)),   # sumsq partials
            pl.BlockSpec((1, D), lambda i: (0, 0)),              # gamma
            pl.BlockSpec((1, D), lambda i: (0, 0)),              # beta
            pl.BlockSpec((D, Dp), lambda i: (0, 0)),             # W^T bf16 (resident)
            pl.BlockSpec((1, Dp), lambda i: (0, 0)),             # bias
        ],
        out_specs=pl.BlockSpec((tm2, Dp), lambda i: (i, 0)),     # lane-dense output
        compiler_params=pltpu.CompilerParams(
            dimension_semantics=("parallel",),
            vmem_limit_bytes=vmem_limit),
        cost_estimate=pl.CostEstimate(
            flops=2 * R * D * Dp + 5 * R * D,
            transcendentals=n_tiles2 * D,
            bytes_accessed=R * D * x_bytes + R * Dp * o_bytes + D * Dp * 2),
    )(x2, s, sq, gamma2, beta2, w_p, b_p)

    if Dp != D:
        out2 = out2[:, :D]
    return out2.reshape(B, N, D)


def prenorm_ref(x, gamma, beta, w_t, b):
    """Pure-JAX reference mirroring the PyTorch forward (training-mode BN, f32)."""
    B, N, D = x.shape
    x2 = x.reshape(B * N, D).astype(jnp.float32)
    mean = jnp.mean(x2, axis=0, keepdims=True)
    var = jnp.mean((x2 - mean) ** 2, axis=0, keepdims=True)
    xhat = (x2 - mean) / jnp.sqrt(var + _EPS)
    y = xhat * gamma.reshape(1, D) + beta.reshape(1, D)
    out = y @ w_t + b.reshape(1, D)
    return out.reshape(B, N, D).astype(x.dtype)


if __name__ == "__main__":
    key = jax.random.PRNGKey(0)
    k_x, k_g, k_b, k_w, k_bias = jax.random.split(key, 5)

    B, N, D = 2, 8, 32  # batch, seq, dim

    x = jax.random.normal(k_x, (B, N, D), dtype=jnp.float32)
    gamma = 1.0 + 0.1 * jax.random.normal(k_g, (D,), dtype=jnp.float32)
    beta = 0.1 * jax.random.normal(k_b, (D,), dtype=jnp.float32)
    w_t = jax.random.normal(k_w, (D, D), dtype=jnp.float32) / jnp.sqrt(D)
    bias = 0.01 * jax.random.normal(k_bias, (D,), dtype=jnp.float32)

    params = prepare_prenorm_params(gamma, beta, w_t, bias)  # pad/cast once
    out = prenorm(x, params)
    out = jax.block_until_ready(out)

    ref = prenorm_ref(x, gamma, beta, w_t, bias)
    assert out.shape == (B, N, D)
    # Tolerance relaxed vs the f32 reference because the Linear runs with bf16
    # MXU inputs (f32 accumulation); BN statistics are computed fully in f32.
    assert jnp.allclose(out, ref, atol=5e-2, rtol=5e-2), "mismatch vs reference"

    print("KERNEL_OK")
</pallas_src>

<mosaic_0001>
module attributes {stable_mosaic.version = 11 : i64} {
  func.func @stats_kernel(%arg0: i32, %arg1: i32, %arg2: memref<16x32xf32, #tpu.memory_space<vmem>>, %arg3: memref<1x1x32xf32, #tpu.memory_space<vmem>>, %arg4: memref<1x1x32xf32, #tpu.memory_space<vmem>>) attributes {dimension_semantics = [#tpu.dimension_semantics<parallel>, #tpu.dimension_semantics<arbitrary>], iteration_bounds = array<i64: 1, 1>, scalar_prefetch = 0 : i64, scratch_operands = 0 : i64, tpu.core_type = #tpu.core_type<tc>, window_params = [{transform_indices = @transform_0, window_bounds = array<i64: 16, 32>}, {transform_indices = @transform_1, window_bounds = array<i64: 1, 1, 32>}, {transform_indices = @transform_2, window_bounds = array<i64: 1, 1, 32>}]} {
    %c0_i32 = arith.constant 0 : i32
    %0 = arith.cmpi eq, %arg1, %c0_i32 : i32
    %1 = arith.extui %0 : i1 to i32
    %c0_i32_0 = arith.constant 0 : i32
    %2 = arith.cmpi ne, %1, %c0_i32_0 : i32
    scf.if %2 {
      %cst_17 = arith.constant 0.000000e+00 : f32
      %29 = vector.broadcast %cst_17 : f32 to vector<1x1x32xf32>
      %c0_18 = arith.constant 0 : index
      %c0_19 = arith.constant 0 : index
      %c0_20 = arith.constant 0 : index
      %30 = vector.load %arg3[%c0_18, %c0_19, %c0_20] : memref<1x1x32xf32, #tpu.memory_space<vmem>>, vector<1x1x32xf32>
      tpu.vector_store %arg3[%c0_18, %c0_19, %c0_20], %29 {strides = array<i32>} : memref<1x1x32xf32, #tpu.memory_space<vmem>>, vector<1x1x32xf32>,
      %cst_21 = arith.constant 0.000000e+00 : f32
      %31 = vector.broadcast %cst_21 : f32 to vector<1x1x32xf32>
      %c0_22 = arith.constant 0 : index
      %c0_23 = arith.constant 0 : index
      %c0_24 = arith.constant 0 : index
      %32 = vector.load %arg4[%c0_22, %c0_23, %c0_24] : memref<1x1x32xf32, #tpu.memory_space<vmem>>, vector<1x1x32xf32>
      tpu.vector_store %arg4[%c0_22, %c0_23, %c0_24], %31 {strides = array<i32>} : memref<1x1x32xf32, #tpu.memory_space<vmem>>, vector<1x1x32xf32>,
    } else {
    }
    %c1_i32 = arith.constant 1 : i32
    %3 = arith.muli %arg0, %c1_i32 : i32
    %4 = arith.addi %3, %arg1 : i32
    %c16_i32 = arith.constant 16 : i32
    %5 = arith.muli %4, %c16_i32 : i32
    %6 = tpu.iota {dimensions = array<i32: 0>} : vector<16x1xi32>
    %7 = vector.broadcast %5 : i32 to vector<16x1xi32>
    %8 = arith.addi %6, %7 : vector<16x1xi32>
    %c16_i32_1 = arith.constant 16 : i32
    %9 = vector.broadcast %c16_i32_1 : i32 to vector<16x1xi32>
    %10 = arith.cmpi slt, %8, %9 : vector<16x1xi32>
    %c0 = arith.constant 0 : index
    %c0_2 = arith.constant 0 : index
    %11 = vector.load %arg2[%c0, %c0_2] : memref<16x32xf32, #tpu.memory_space<vmem>>, vector<16x32xf32>
    %cst = arith.constant 0.000000e+00 : f32
    %12 = vector.shape_cast %10 : vector<16x1xi1> to vector<16x1xi1>
    %13 = vector.broadcast %12 : vector<16x1xi1> to vector<16x32xi1>
    %14 = vector.broadcast %cst : f32 to vector<16x32xf32>
    %15 = arith.select %13, %11, %14 : vector<16x32xi1>, vector<16x32xf32>
    %c0_3 = arith.constant 0 : index
    %c0_4 = arith.constant 0 : index
    %c0_5 = arith.constant 0 : index
    %16 = vector.load %arg3[%c0_3, %c0_4, %c0_5] : memref<1x1x32xf32, #tpu.memory_space<vmem>>, vector<1x1x32xf32>
    %cst_6 = arith.constant dense<0.000000e+00> : vector<32xf32>
    %17 = vector.multi_reduction <add>, %15, %cst_6 [0] : vector<16x32xf32> to vector<32xf32>
    %18 = vector.shape_cast %17 : vector<32xf32> to vector<1x32xf32>
    %19 = vector.shape_cast %18 : vector<1x32xf32> to vector<1x1x32xf32>
    %20 = arith.addf %16, %19 : vector<1x1x32xf32>
    %c0_7 = arith.constant 0 : index
    %c0_8 = arith.constant 0 : index
    %c0_9 = arith.constant 0 : index
    %21 = vector.load %arg3[%c0_7, %c0_8, %c0_9] : memref<1x1x32xf32, #tpu.memory_space<vmem>>, vector<1x1x32xf32>
    tpu.vector_store %arg3[%c0_7, %c0_8, %c0_9], %20 {strides = array<i32>} : memref<1x1x32xf32, #tpu.memory_space<vmem>>, vector<1x1x32xf32>,
    %c0_10 = arith.constant 0 : index
    %c0_11 = arith.constant 0 : index
    %c0_12 = arith.constant 0 : index
    %22 = vector.load %arg4[%c0_10, %c0_11, %c0_12] : memref<1x1x32xf32, #tpu.memory_space<vmem>>, vector<1x1x32xf32>
    %23 = arith.mulf %15, %15 : vector<16x32xf32>
    %cst_13 = arith.constant dense<0.000000e+00> : vector<32xf32>
    %24 = vector.multi_reduction <add>, %23, %cst_13 [0] : vector<16x32xf32> to vector<32xf32>
    %25 = vector.shape_cast %24 : vector<32xf32> to vector<1x32xf32>
    %26 = vector.shape_cast %25 : vector<1x32xf32> to vector<1x1x32xf32>
    %27 = arith.addf %22, %26 : vector<1x1x32xf32>
    %c0_14 = arith.constant 0 : index
    %c0_15 = arith.constant 0 : index
    %c0_16 = arith.constant 0 : index
    %28 = vector.load %arg4[%c0_14, %c0_15, %c0_16] : memref<1x1x32xf32, #tpu.memory_space<vmem>>, vector<1x1x32xf32>
    tpu.vector_store %arg4[%c0_14, %c0_15, %c0_16], %27 {strides = array<i32>} : memref<1x1x32xf32, #tpu.memory_space<vmem>>, vector<1x1x32xf32>,
    return
  }
  func.func @transform_0(%arg0: i32, %arg1: i32) -> (i32, i32) {
    %c1_i32 = arith.constant 1 : i32
    %0 = arith.muli %arg0, %c1_i32 : i32
    %1 = arith.addi %0, %arg1 : i32
    %c0_i32 = arith.constant 0 : i32
    %2 = arith.minsi %1, %c0_i32 : i32
    %c0_i32_0 = arith.constant 0 : i32
    %c0_i32_1 = arith.constant 0 : i32
    return %2, %c0_i32_0 : i32, i32
  }
  func.func @transform_1(%arg0: i32, %arg1: i32) -> (i32, i32, i32) {
    %c0_i32 = arith.constant 0 : i32
    %c0_i32_0 = arith.constant 0 : i32
    %c0_i32_1 = arith.constant 0 : i32
    return %arg0, %c0_i32, %c0_i32_0 : i32, i32, i32
  }
  func.func @transform_2(%arg0: i32, %arg1: i32) -> (i32, i32, i32) {
    %c0_i32 = arith.constant 0 : i32
    %c0_i32_0 = arith.constant 0 : i32
    %c0_i32_1 = arith.constant 0 : i32
    return %arg0, %c0_i32, %c0_i32_0 : i32, i32, i32
  }
}

</mosaic_0001>

<bundles_post_ra>
// kernel: tpu_custom_call.1
= control target key start
LH: loop header
LB: loop body
LE: loop exit
PB: predicated region body
PF: predicated region fallthrough
CT: control target
= control target key end

     0   :  { %8 = vsyncpa [#allocation3], 0  ;;  %s267_s0 = inlined_call_operand.hbm [shape: f32[16,32], index: 0, kind: input, shape index: {}]   ;;  %s268_s1 = inlined_call_operand.hbm [shape: f32[1,1,32], index: 1, kind: output, shape index: {0}]   ;;  %s269_s2 = inlined_call_operand.hbm [shape: f32[1,1,32], index: 2, kind: output, shape index: {1}]  }
   0x1   :  { %9 = vsyncpa [#allocation4], 0 }
   0x2   :  { %10 = vsyncpa [#allocation7], 0  ;;  %s198_s9 = smov [#allocation2]   ;;  %s126_s13 = scalar_lea.hbm %s267_s0, 256 }
   0x3   :  { %s22_s10 = sshll.u32 %s198_s9, 4  ;;  %p127_p0 = scmp.ne.s32.totalorder %s267_s0, %s126_s13  ;;  %s23_s10 = int_to_ptr.vmem [resolvable:$true] %s22_s10 }
   0x4   :  { %p130_p1 = scmp.lt.u32.totalorder %s126_s13, %s267_s0 }
   0x6   :  { %p132_p2 = pnand %p130_p1, %p127_p0 }
   0x8   :  { %135 = shalt.err (!%p132_p2)
}
   0x9   :  { %s136_s18 = scalar_lea.vmem %s23_s10, 256  ;;  %p141_p4 = scmp.lt.s32.totalorder %s23_s10, %s23_s10 }
   0xa   :  { %p137_p3 = scmp.ne.s32.totalorder %s23_s10, %s136_s18  ;;  %p142_p5 = scmp.lt.s32.totalorder %s136_s18, %s136_s18 }
   0xc   :  { %p143_p6 = por %p142_p5, %p141_p4 }
   0xe   :  { %p144_p7 = pnand %p143_p6, %p137_p3 }
  0x10   :  { %147 = shalt.err (!%p144_p7)
}
  0x11   :  { %s199_s19 = smov 128   ;;  %s200_s20 = smov 8  }
  0x12   :  { %28 = dma.hbm_to_vmem [thread:$0]  %s267_s0, 256, %s23_s10, [#allocation3], %s199_s19, %s199_s19, %s200_s20  }
  0x13   :  { %192 = dma.done.wait [#allocation3], 256  }
  0x14   :  { %193 = vsyncadd [#allocation3], 4294967040  ;;  %vm40_vm0 = vcmask 253952   ;;  %v201_v0 = vmov 0.0   ;;  %vm62_vm1 = vcmask 261120   ;;  %v53_v1 = vld [vmem:[#allocation2] sm:$0xff] }
  0x15   :  { %41 = vst.msk [vmem:[#allocation5] sm:$0x1] %vm40_vm0, %v201_v0  ;;  %42 = vst.msk [vmem:[#allocation6] sm:$0x1] %vm40_vm0, %v201_v0  ;;  %v54_v2 = vld [vmem:[#allocation2 + $0x8] sm:$0xff]  ;;  %v63_v3 = vsel %vm62_vm1, %v53_v1, 0.0  ;;  %v76_v5 = vmul.f32 %v53_v1, %v53_v1 }
  0x16   :  { %v64_v4 = vsel %vm62_vm1, %v54_v2, 0.0  ;;  %v77_v6 = vmul.f32 %v54_v2, %v54_v2  ;;  %s202_s0 = smov [#allocation5]   ;;  %s203_s24 = smov [#allocation6]  }
  0x17   :  { %v65_v7 = vadd.f32 %v64_v4, %v63_v3  ;;  %v78_v8 = vsel %vm62_vm1, %v76_v5, 0.0  ;;  %s95_s23 = sshll.u32 %s202_s0, 4  ;;  %s105_s25 = sshll.u32 %s203_s24, 4  ;;  %s96_s23 = int_to_ptr.vmem [resolvable:$true] %s95_s23  ;;  %s234_s25 = int_to_ptr.vmem [resolvable:$true] %s105_s25 }
  0x18   :  { %v79_v9 = vsel %vm62_vm1, %v77_v6, 0.0  ;;  %s148_s26 = scalar_lea.vmem %s96_s23, 16  ;;  %s152_s27 = scalar_lea.vmem %s96_s23, 32 }
  0x19   :  { %v66_v10 = vrot.slane %v65_v7, 4  ;;  %v80_v11 = vadd.f32 %v79_v9, %v78_v8  ;;  %p149_p8 = scmp.ne.s32.totalorder %s96_s23, %s148_s26  ;;  %p153_p9 = scmp.lt.s32.totalorder %s96_s23, %s96_s23 }
  0x1a   :  { %p154_p10 = scmp.lt.s32.totalorder %s152_s27, %s148_s26 }
  0x1b   :  { %v67_v12 = vadd.f32 %v66_v10, %v65_v7  ;;  %v81_v13 = vrot.slane %v80_v11, 4 }
  0x1c   :  { %v61_v20 = vld [vmem:[#allocation5] sm:$0x1]  ;;  %v75_v23 = vld [vmem:[#allocation6] sm:$0x1]  ;;  %p155_p11 = por %p154_p10, %p153_p9 }
  0x1d   :  { %v68_v14 = vrot.slane %v67_v12, 2  ;;  %v82_v15 = vadd.f32 %v81_v13, %v80_v11 }
  0x1e   :  { %p156_p12 = pnand %p155_p11, %p149_p8 }
  0x1f   :  { %v69_v16 = vadd.f32 %v68_v14, %v67_v12  ;;  %v83_v17 = vrot.slane %v82_v15, 2 }
  0x21   :  { %v70_v18 = vrot.slane %v69_v16, 1  ;;  %v84_v19 = vadd.f32 %v83_v17, %v82_v15 }
  0x23   :  { %v71_v21 = vadd.f32 %v70_v18, %v69_v16  ;;  %v85_v22 = vrot.slane %v84_v19, 1 }
  0x25   :  { %v72_v24 = vadd.f32 %v71_v21, %v61_v20  ;;  %v86_v25 = vadd.f32 %v85_v22, %v84_v19 }
  0x27   :  { %74 = vst.msk [vmem:[#allocation5] sm:$0x1] %vm40_vm0, %v72_v24  ;;  %v87_v26 = vadd.f32 %v86_v25, %v75_v23 }
  0x28   :  { %159 = shalt.err (!%p156_p12)
}
  0x29   :  { %s160_s30 = scalar_lea.hbm %s268_s1, 16 }
  0x2a   :  { %p161_p13 = scmp.ne.s32.totalorder %s268_s1, %s160_s30  ;;  %p164_p0 = scmp.lt.u32.totalorder %s160_s30, %s268_s1 }
  0x2c   :  { %p166_p1 = pnand %p164_p0, %p161_p13 }
  0x2e   :  { %169 = shalt.err (!%p166_p1)
}
  0x2f   :  { %98 = dma.vmem_to_hbm [thread:$0]  %s96_s23, 16, %s268_s1, [#allocation4]   ;;  %88 = vst.msk [vmem:[#allocation6] sm:$0x1] %vm40_vm0, %v87_v26 }
  0x30   :  { %s170_s9 = scalar_lea.vmem %s234_s25, 16  ;;  %s174_s10 = scalar_lea.vmem %s234_s25, 32 }
  0x31   :  { %p171_p2 = scmp.ne.s32.totalorder %s234_s25, %s170_s9  ;;  %p175_p3 = scmp.lt.s32.totalorder %s234_s25, %s234_s25 }
  0x32   :  { %p176_p4 = scmp.lt.s32.totalorder %s174_s10, %s170_s9 }
  0x34   :  { %p177_p5 = por %p176_p4, %p175_p3 }
  0x36   :  { %p178_p6 = pnand %p177_p5, %p171_p2 }
  0x38   :  { %181 = shalt.err (!%p178_p6)
}
  0x39   :  { %s182_s13 = scalar_lea.hbm %s269_s2, 16 }
  0x3a   :  { %p183_p7 = scmp.ne.s32.totalorder %s269_s2, %s182_s13  ;;  %p186_p8 = scmp.lt.u32.totalorder %s182_s13, %s269_s2 }
  0x3c   :  { %p188_p9 = pnand %p186_p8, %p183_p7 }
  0x3e   :  { %191 = shalt.err (!%p188_p9)
}
  0x3f   :  { %108 = dma.vmem_to_hbm [thread:$0]  %s234_s25, 16, %s269_s2, [#allocation7]  }
  0x40   :  { %194 = dma.done.wait [#allocation4], 16  }
  0x41   :  { %195 = vsyncadd [#allocation4], 4294967280 }
  0x42   :  { %196 = dma.done.wait [#allocation7], 16  }
  0x43   :  { %197 = vsyncadd [#allocation7], 4294967280 }
  0x44   :  { %115 = vsyncpa [#allocation3], 1 }
  0x45   :  { %116 = vsyncpa [#allocation4], 1 }
  0x46   :  { %117 = vsyncpa [#allocation7], 1 }

</bundles_post_ra>
